<compile_context>
chip_gen: v6e
topology: v6e:2x2x1
jax: 0.10.0
libtpu: 0.0.40
codegen_flags: <defaults>
</compile_context>

<pallas_src>
import math

import numpy as np

import jax
import jax.numpy as jnp
from jax.experimental import pallas as pl
from jax.experimental.pallas import tpu as pltpu


# ---------------------------------------------------------------------------
# Kernel bodies
# ---------------------------------------------------------------------------

def _dot_kernel(lhs_ref, w_ref, o_ref):
    """Prebuilt-LHS path: one MXU matmul + lane-dense store."""
    o_ref[...] = jnp.dot(
        lhs_ref[...], w_ref[...],
        preferred_element_type=jnp.float32).astype(o_ref.dtype)


def _make_shift_kernel(has_mark):
    """In-kernel-shift path (used when c_in is lane-dense, c_in >= 128)."""
    def kernel(*refs):
        if has_mark:
            x_ref, xm_ref, w_ref, o_ref = refs
        else:
            x_ref, w_ref, o_ref = refs
        bt, seq_len, _ = x_ref.shape
        x = x_ref[...]
        # Circular padding=1, kernel=3:
        #   out[t] = W0 @ x[(t-1)%L] + W1 @ x[t] + W2 @ x[(t+1)%L]
        # Non-negative XLU sublane rotates (negative shifts are rejected by Mosaic).
        x_prev = pltpu.roll(x, shift=1, axis=1)             # x_prev[t] = x[t-1]
        x_next = pltpu.roll(x, shift=seq_len - 1, axis=1)   # x_next[t] = x[t+1]
        pieces = [x_prev, x, x_next]
        if has_mark:
            pieces.append(xm_ref[...])
        lhs = jnp.concatenate(pieces, axis=-1)               # (bt, L, K)
        k = lhs.shape[-1]
        # Cast right before the dot: keep the shuffles in the input dtype
        # (v5e's VPU/XLU have no bf16 path).
        out = jnp.dot(
            lhs.reshape(bt * seq_len, k).astype(w_ref.dtype), w_ref[...],
            preferred_element_type=jnp.float32)
        o_ref[...] = out.reshape(bt, seq_len, o_ref.shape[-1]).astype(o_ref.dtype)
    return kernel


# ---------------------------------------------------------------------------
# Tiling helpers
# ---------------------------------------------------------------------------

def _pick_row_tile(m_total, row_bytes, min_steps=8, max_block_bytes=2 << 20):
    """Largest multiple-of-8 divisor of m_total giving >= min_steps grid steps
    (when possible) and <= ~2 MiB per block."""
    divs = [t for t in range(8, m_total + 1, 8) if m_total % t == 0]
    if not divs:
        # No multiple-of-8 divisor: single full block (block dim == array dim).
        return m_total
    cands = [t for t in divs if m_total // t >= min_steps] or divs
    good = [t for t in cands if t * row_bytes <= max_block_bytes]
    return max(good) if good else min(cands)


def _pick_batch_block(batch, per_seq_bytes, min_steps=8, max_block_bytes=2 << 20):
    divs = [t for t in range(1, batch + 1) if batch % t == 0]
    cands = [t for t in divs if batch // t >= min_steps] or divs
    good = [t for t in cands if t * per_seq_bytes <= max_block_bytes]
    return max(good) if good else min(cands)


def _vmem_limit(block_bytes):
    # Computed need + margin, capped at 40 MiB (v7x has only 64 MiB VMEM per TC).
    return int(min(40 << 20, max(16 << 20, 4 * block_bytes)))


# ---------------------------------------------------------------------------
# Forward wrapper
# ---------------------------------------------------------------------------

def data_embedding_wo_pos(x, x_mark, conv_w, lin_w, *,
                          compute_dtype=jnp.float32,
                          out_dtype=None,
                          lhs_in_kernel=None):
    """DataEmbedding_wo_pos forward (dropout = identity, eval mode).

    x      : (B, L, c_in) or None
    x_mark : (B, L, 4)    or None
    conv_w : (d_model, c_in, 3)   PyTorch Conv1d weight layout
    lin_w  : (d_model, 4)         PyTorch Linear weight layout
    returns: (B, L, d_model)

    compute_dtype : dtype fed to the MXU (bf16 recommended on v6e/v7x; f32 accumulation).
    out_dtype     : defaults to compute_dtype (the (B,L,D) write dominates HBM traffic).
    lhs_in_kernel : force the in-kernel pltpu.roll path (default: only when c_in >= 128).
    """
    if out_dtype is None:
        out_dtype = compute_dtype

    d_model = lin_w.shape[0]
    freq = lin_w.shape[1]

    if x is None:
        # Temporal embedding only: tiny K=4 matmul, plain JAX.
        return jnp.dot(x_mark.astype(compute_dtype),
                       lin_w.T.astype(compute_dtype)).astype(out_dtype)

    B, L, c_in = x.shape
    has_mark = x_mark is not None

    # Fused weight: rows = [W0^T; W1^T; W2^T; lin_w^T]   (K, D), K = 3C (+F).
    wc = jnp.transpose(conv_w, (2, 1, 0))                      # (3, C, D)
    w_rows = [wc[0], wc[1], wc[2]]
    if has_mark:
        w_rows.append(lin_w.T)
    w_fused = jnp.concatenate(w_rows, axis=0).astype(compute_dtype)   # (K, D)
    K = 3 * c_in + (freq if has_mark else 0)

    if lhs_in_kernel is None:
        lhs_in_kernel = c_in >= 128

    cmp_item = np.dtype(compute_dtype).itemsize
    out_item = np.dtype(out_dtype).itemsize

    if not lhs_in_kernel:
        # -------------------------------------------------------------------
        # Path A (default, c_in << 128): LHS built in the wrapper
        # (roll + concat + cast fuse into one XLA pass); kernel = dot + store.
        # -------------------------------------------------------------------
        # Group g consecutive time steps so the output row width g*D is a
        # multiple of 128 lanes (unmasked vst).  Block-diagonal weight keeps
        # the math exact; extra MXU FLOPs (x g) are free under the HBM bound.
        g = 128 // math.gcd(d_model, 128)
        if g > 16 or L % g != 0:
            g = 1                       # fall back to masked partial stores
        gK, gD = g * K, g * d_model

        x_c = x.astype(compute_dtype)
        pieces = [jnp.roll(x_c, 1, axis=1), x_c, jnp.roll(x_c, -1, axis=1)]
        if has_mark:
            pieces.append(x_mark.astype(compute_dtype))
        lhs = jnp.concatenate(pieces, axis=-1)                  # (B, L, K)
        m_total = (B * L) // g
        lhs = lhs.reshape(m_total, gK)                          # contiguous reshape

        if g > 1:
            w_big = jnp.kron(jnp.eye(g, dtype=compute_dtype), w_fused)   # (gK, gD)
        else:
            w_big = w_fused

        row_bytes = gK * cmp_item + gD * out_item + gD * 4      # lhs + out + f32 acc
        tm = _pick_row_tile(m_total, row_bytes)
        grid = (m_total // tm,)

        block_bytes = (2 * tm * gK * cmp_item + 2 * tm * gD * out_item
                       + 2 * gK * gD * cmp_item + tm * gD * 4)

        flops = 2 * m_total * gK * gD
        bytes_accessed = (lhs.size * cmp_item + w_big.size * cmp_item
                          + m_total * gD * out_item)

        out2 = pl.pallas_call(
            _dot_kernel,
            out_shape=jax.ShapeDtypeStruct((m_total, gD), out_dtype),
            grid_spec=pltpu.PrefetchScalarGridSpec(
                num_scalar_prefetch=0,
                grid=grid,
                in_specs=[
                    pl.BlockSpec((tm, gK), lambda i: (i, 0)),
                    pl.BlockSpec((gK, gD), lambda i: (0, 0)),
                ],
                out_specs=pl.BlockSpec((tm, gD), lambda i: (i, 0)),
            ),
            compiler_params=pltpu.CompilerParams(
                dimension_semantics=("parallel",),
                vmem_limit_bytes=_vmem_limit(block_bytes),
            ),
            cost_estimate=pl.CostEstimate(
                flops=flops, transcendentals=0, bytes_accessed=bytes_accessed),
        )(lhs, w_big)
        return out2.reshape(B, L, d_model)      # contiguous, free

    # -----------------------------------------------------------------------
    # Path B (c_in >= 128): circular shifts in-kernel via pltpu.roll
    # (non-negative shifts 1 and L-1 -> XLU sublane rotates).
    # -----------------------------------------------------------------------
    x_item = np.dtype(x.dtype).itemsize
    per_seq_bytes = (L * (c_in + (freq if has_mark else 0)) * x_item
                     + L * d_model * out_item + L * d_model * 4)
    bt = _pick_batch_block(B, per_seq_bytes)
    grid = (B // bt,)

    block_bytes = 2 * bt * per_seq_bytes + 2 * K * d_model * cmp_item

    flops = 2 * B * L * K * d_model
    bytes_accessed = (x.size * x_item
                      + (x_mark.size * np.dtype(x_mark.dtype).itemsize
                         if has_mark else 0)
                      + K * d_model * cmp_item
                      + B * L * d_model * out_item)

    in_specs = [pl.BlockSpec((bt, L, c_in), lambda b: (b, 0, 0))]
    operands = [x]
    if has_mark:
        in_specs.append(pl.BlockSpec((bt, L, freq), lambda b: (b, 0, 0)))
        operands.append(x_mark)
    in_specs.append(pl.BlockSpec((K, d_model), lambda b: (0, 0)))
    operands.append(w_fused)

    return pl.pallas_call(
        _make_shift_kernel(has_mark),
        out_shape=jax.ShapeDtypeStruct((B, L, d_model), out_dtype),
        grid_spec=pltpu.PrefetchScalarGridSpec(
            num_scalar_prefetch=0,
            grid=grid,
            in_specs=in_specs,
            out_specs=pl.BlockSpec((bt, L, d_model), lambda b: (b, 0, 0)),
        ),
        compiler_params=pltpu.CompilerParams(
            dimension_semantics=("parallel",),
            vmem_limit_bytes=_vmem_limit(block_bytes),
        ),
        cost_estimate=pl.CostEstimate(
            flops=flops, transcendentals=0, bytes_accessed=bytes_accessed),
    )(*operands)


# ---------------------------------------------------------------------------
# Pure-JAX reference
# ---------------------------------------------------------------------------

def _reference(x, x_mark, conv_w, lin_w):
    x_prev = jnp.roll(x, 1, axis=1)
    x_next = jnp.roll(x, -1, axis=1)
    w0 = conv_w[:, :, 0].T
    w1 = conv_w[:, :, 1].T
    w2 = conv_w[:, :, 2].T
    val = x_prev @ w0 + x @ w1 + x_next @ w2
    if x_mark is None:
        return val
    return val + x_mark @ lin_w.T


if __name__ == "__main__":
    B, L, C_IN, D_MODEL, FREQ = 2, 16, 4, 32, 4

    key = jax.random.PRNGKey(0)
    kx, km, kc, kl = jax.random.split(key, 4)

    x = jax.random.normal(kx, (B, L, C_IN), dtype=jnp.float32)
    x_mark = jax.random.normal(km, (B, L, FREQ), dtype=jnp.float32)

    # Conv1d weight (d_model, c_in, 3): kaiming_normal fan_in, leaky_relu(a=0.01).
    a = 0.01
    gain = (2.0 / (1.0 + a * a)) ** 0.5
    fan_in = C_IN * 3
    conv_w = gain / (fan_in ** 0.5) * jax.random.normal(
        kc, (D_MODEL, C_IN, 3), dtype=jnp.float32)

    # Linear(4, d_model, bias=False): uniform(-k, k), k = 1/sqrt(4).
    bound = 1.0 / (FREQ ** 0.5)
    lin_w = jax.random.uniform(
        kl, (D_MODEL, FREQ), dtype=jnp.float32, minval=-bound, maxval=bound)

    ref = _reference(x, x_mark, conv_w, lin_w)

    # 1) f32, default path (prebuilt LHS + lane-dense grouped output).
    out = jax.block_until_ready(data_embedding_wo_pos(x, x_mark, conv_w, lin_w))
    assert out.shape == (B, L, D_MODEL)
    assert jnp.allclose(out, ref, atol=1e-5, rtol=1e-5), "path A f32 mismatch"

    # 2) f32, in-kernel pltpu.roll path (large-c_in path, forced here).
    out_b = jax.block_until_ready(
        data_embedding_wo_pos(x, x_mark, conv_w, lin_w, lhs_in_kernel=True))
    assert out_b.shape == (B, L, D_MODEL)
    assert jnp.allclose(out_b, ref, atol=1e-5, rtol=1e-5), "path B f32 mismatch"

    # 3) bf16 compute + bf16 output (v6e/v7x HBM-bound configuration).
    out_bf16 = jax.block_until_ready(
        data_embedding_wo_pos(x, x_mark, conv_w, lin_w,
                              compute_dtype=jnp.bfloat16))
    assert out_bf16.dtype == jnp.bfloat16
    assert jnp.allclose(out_bf16.astype(jnp.float32), ref,
                        atol=5e-2, rtol=5e-2), "bf16 mismatch vs reference"

    # 4) x_mark is None (value embedding only; temporal rows / stream dropped).
    out_vo = jax.block_until_ready(data_embedding_wo_pos(x, None, conv_w, lin_w))
    assert jnp.allclose(out_vo, _reference(x, None, conv_w, lin_w),
                        atol=1e-5, rtol=1e-5), "x_mark=None mismatch"

    # 5) x is None (temporal embedding only; plain JAX).
    out_to = jax.block_until_ready(data_embedding_wo_pos(None, x_mark, conv_w, lin_w))
    assert jnp.allclose(out_to, x_mark @ lin_w.T, atol=1e-5, rtol=1e-5), \
        "x=None mismatch"

    print("KERNEL_OK")
</pallas_src>

<mosaic_0001>
module attributes {stable_mosaic.version = 11 : i64} {
  func.func @_dot_kernel(%arg0: i32, %arg1: memref<8x64xf32, #tpu.memory_space<vmem>>, %arg2: memref<64x128xf32, #tpu.memory_space<vmem>>, %arg3: memref<8x128xf32, #tpu.memory_space<vmem>>) attributes {dimension_semantics = [#tpu.dimension_semantics<parallel>], iteration_bounds = array<i64: 1>, scalar_prefetch = 0 : i64, scratch_operands = 0 : i64, tpu.core_type = #tpu.core_type<tc>, window_params = [{transform_indices = @transform_0, window_bounds = array<i64: 8, 64>}, {pipeline_mode = #tpu.pipeline_mode<synchronous>, transform_indices = @transform_1, window_bounds = array<i64: 64, 128>}, {transform_indices = @transform_2, window_bounds = array<i64: 8, 128>}]} {
    %c0 = arith.constant 0 : index
    %c0_0 = arith.constant 0 : index
    %0 = vector.load %arg1[%c0, %c0_0] : memref<8x64xf32, #tpu.memory_space<vmem>>, vector<8x64xf32>
    %c0_1 = arith.constant 0 : index
    %c0_2 = arith.constant 0 : index
    %1 = vector.load %arg2[%c0_1, %c0_2] : memref<64x128xf32, #tpu.memory_space<vmem>>, vector<64x128xf32>
    %cst = arith.constant dense<0.000000e+00> : vector<8x128xf32>
    %2 = tpu.matmul %0, %1, %cst {dimension_numbers = #tpu.dot_dimension_numbers<[1], [0], [0], [1], [0, 0, 1, 1], [], []>} : vector<8x64xf32>, vector<64x128xf32>, vector<8x128xf32> -> vector<8x128xf32>
    %c0_3 = arith.constant 0 : index
    %c0_4 = arith.constant 0 : index
    %3 = vector.load %arg3[%c0_3, %c0_4] : memref<8x128xf32, #tpu.memory_space<vmem>>, vector<8x128xf32>
    tpu.vector_store %arg3[%c0_3, %c0_4], %2 {strides = array<i32>} : memref<8x128xf32, #tpu.memory_space<vmem>>, vector<8x128xf32>,
    return
  }
  func.func @transform_0(%arg0: i32) -> (i32, i32) {
    %c0_i32 = arith.constant 0 : i32
    %c0_i32_0 = arith.constant 0 : i32
    return %arg0, %c0_i32 : i32, i32
  }
  func.func @transform_1(%arg0: i32) -> (i32, i32) {
    %c0_i32 = arith.constant 0 : i32
    %c0_i32_0 = arith.constant 0 : i32
    %c0_i32_1 = arith.constant 0 : i32
    return %c0_i32, %c0_i32_0 : i32, i32
  }
  func.func @transform_2(%arg0: i32) -> (i32, i32) {
    %c0_i32 = arith.constant 0 : i32
    %c0_i32_0 = arith.constant 0 : i32
    return %arg0, %c0_i32 : i32, i32
  }
}

</mosaic_0001>

<bundles_post_ra>
// kernel: tpu_custom_call.1
= control target key start
LH: loop header
LB: loop body
LE: loop exit
PB: predicated region body
PF: predicated region fallthrough
CT: control target
= control target key end

     0   :  { %7 = vsyncpa [#allocation3], 0  ;;  %s271_s0 = inlined_call_operand.hbm [shape: f32[8,64], index: 0, kind: input, shape index: {}]   ;;  %s272_s1 = inlined_call_operand.hbm [shape: f32[64,128], index: 1, kind: input, shape index: {}]   ;;  %s273_s2 = inlined_call_operand.hbm [shape: f32[8,128], index: 2, kind: output, shape index: {}]  }
   0x1   :  { %8 = vsyncpa [#allocation6], 0 }
   0x2   :  { %9 = vsyncpa [#allocation4], 0  ;;  %s240_s9 = smov [#allocation2]   ;;  %s241_s11 = smov [#allocation5]  }
   0x3   :  { %s16_s10 = sshll.u32 %s240_s9, 4  ;;  %s25_s12 = sshll.u32 %s241_s11, 4  ;;  %s17_s10 = int_to_ptr.vmem [resolvable:$true] %s16_s10  ;;  %s26_s12 = int_to_ptr.vmem [resolvable:$true] %s25_s12 }
   0x4   :  { %s182_s13 = scalar_lea.vmem %s17_s10, 128  ;;  %p187_p1 = scmp.lt.s32.totalorder %s17_s10, %s17_s10 }
   0x5   :  { %p183_p0 = scmp.ne.s32.totalorder %s17_s10, %s182_s13  ;;  %p188_p2 = scmp.lt.s32.totalorder %s182_s13, %s182_s13 }
   0x7   :  { %p189_p3 = por %p188_p2, %p187_p1 }
   0x9   :  { %p190_p4 = pnand %p189_p3, %p183_p0 }
   0xb   :  { %193 = shalt.err (!%p190_p4)
}
   0xc   :  { %19 = dma.hbm_to_vmem [thread:$0]  %s271_s0, 128, %s17_s10, [#allocation3]  }
   0xd   :  { %s202_s16 = scalar_lea.vmem %s26_s12, 1024  ;;  %p207_p6 = scmp.lt.s32.totalorder %s26_s12, %s26_s12 }
   0xe   :  { %p203_p5 = scmp.ne.s32.totalorder %s26_s12, %s202_s16  ;;  %p208_p7 = scmp.lt.s32.totalorder %s202_s16, %s202_s16 }
  0x10   :  { %p209_p8 = por %p208_p7, %p207_p6 }
  0x12   :  { %p210_p9 = pnand %p209_p8, %p203_p5 }
  0x14   :  { %213 = shalt.err (!%p210_p9)
}
  0x15   :  { %s242_s17 = smov 128   ;;  %s243_s18 = smov 8  }
  0x16   :  { %31 = dma.hbm_to_vmem [thread:$0]  %s272_s1, 1024, %s26_s12, [#allocation6], %s242_s17, %s242_s17, %s243_s18  }
  0x17   :  { %234 = dma.done.wait [#allocation3], 128  }
  0x18   :  { %235 = vsyncadd [#allocation3], 4294967168 }
  0x19   :  { %236 = dma.done.wait [#allocation6], 1024  }
  0x1a   :  { %237 = vsyncadd [#allocation6], 4294966272  ;;  %v244_v0 = vmov 0.0   ;;  %vm245_vm0 = vmmov 0   ;;  %v46_v1 = vld [vmem:[#allocation5 + $0x38] sm:$0xff]  ;;  %v45_v2 = vld [vmem:[#allocation5 + $0x30] sm:$0xff] }
  0x1b   :  { %148 = vmatprep.subr.mxu0 %v244_v0  ;;  %164 = vmatprep.mubr.msk.f32.mxu0 %vm245_vm0, %v244_v0  ;;  %v44_v3 = vld [vmem:[#allocation5 + $0x28] sm:$0xff]  ;;  %v43_v4 = vld [vmem:[#allocation5 + $0x20] sm:$0xff]  ;;  %v42_v5 = vld [vmem:[#allocation5 + $0x18] sm:$0xff]  ;;  %vm47_vm1 = vcmask 523264   ;;  %s246_s0 = smov [#allocation7]  }
  0x1c   :  { %149 = vmatpush3.msra.mxu0 %v46_v1  ;;  %v41_v6 = vld [vmem:[#allocation5 + $0x10] sm:$0xff]  ;;  %v40_v7 = vld [vmem:[#allocation5 + $0x8] sm:$0xff]  ;;  %v39_v8 = vld [vmem:[#allocation5] sm:$0xff]  ;;  %s128_s1 = sshll.u32 %s246_s0, 4  ;;  %s129_s1 = int_to_ptr.vmem [resolvable:$true] %s128_s1 }
  0x1d   :  { %150 = vmatprep.subr.mxu0 %v244_v0  ;;  %v38_v9 = vld [vmem:[#allocation2] sm:$0xff]  ;;  %s214_s21 = scalar_lea.vmem %s129_s1, 128  ;;  %p219_p11 = scmp.lt.s32.totalorder %s129_s1, %s129_s1 }
  0x1e   :  { %151 = vmatpush3.msra.mxu0 %v45_v2  ;;  %p215_p10 = scmp.ne.s32.totalorder %s129_s1, %s214_s21  ;;  %p220_p12 = scmp.lt.s32.totalorder %s214_s21, %s214_s21 }
  0x1f   :  { %152 = vmatprep.subr.mxu0 %v244_v0 }
  0x20   :  { %153 = vmatpush3.msra.mxu0 %v44_v3  ;;  %p221_p13 = por %p220_p12, %p219_p11 }
  0x21   :  { %154 = vmatprep.subr.mxu0 %v244_v0 }
  0x22   :  { %155 = vmatpush3.msra.mxu0 %v43_v4  ;;  %p222_p0 = pnand %p221_p13, %p215_p10 }
  0x23   :  { %156 = vmatprep.subr.mxu0 %v244_v0 }
  0x24   :  { %157 = vmatpush3.msra.mxu0 %v42_v5 }
  0x25   :  { %158 = vmatprep.subr.mxu0 %v244_v0 }
  0x26   :  { %159 = vmatpush3.msra.mxu0 %v41_v6 }
  0x27   :  { %160 = vmatprep.subr.mxu0 %v244_v0 }
  0x28   :  { %161 = vmatpush3.msra.mxu0 %v40_v7 }
  0x29   :  { %162 = vmatprep.subr.mxu0 %v244_v0 }
  0x2a   :  { %163 = vmatpush3.msra.mxu0 %v39_v8 }
  0x2b   :  { %165 = vmatmul.mubr.msk.f32.vlgmr.msra.gmra.mxu0 %vm47_vm1, %v38_v9 }
  0xeb   :  { %v117_v10 = vpop.f32.mrf.mxu0 }
  0xec   :  { %121 = vst [vmem:[#allocation7] sm:$0xff] %v117_v10 }
  0xed   :  { %v166_v11 = vpop.f32.mrf.mxu0 }
  0xee   :  { %225 = shalt.err (!%p222_p0)
}
  0xef   :  { %131 = dma.vmem_to_hbm [thread:$0]  %s129_s1, 128, %s273_s2, [#allocation4]  }
  0xf0   :  { %238 = dma.done.wait [#allocation4], 128  }
  0xf1   :  { %239 = vsyncadd [#allocation4], 4294967168 }
  0xf2   :  { %135 = vsyncpa [#allocation3], 1 }
  0xf3   :  { %136 = vsyncpa [#allocation6], 1 }
  0xf4   :  { %137 = vsyncpa [#allocation4], 1 }

</bundles_post_ra>
